<compile_context>
chip_gen: v7x
topology: tpu7x:2x2x1
jax: 0.10.0
libtpu: 0.0.40
codegen_flags: <defaults>
</compile_context>

<pallas_src>
import jax
import jax.numpy as jnp
from jax.experimental import pallas as pl
from jax.experimental.pallas import tpu as pltpu


def _round_up(n, m):
    return ((n + m - 1) // m) * m


# ----------------------------------------------------------------------------
# Kernels
# ----------------------------------------------------------------------------
def _cls_head_kernel_resident(x_ref, w1_ref, b1_ref, w2_ref, b2_ref, out_ref):
    # x: [TB, Hp]  w1: [Hp, Hp]  b1: [1, Hp] (f32)  w2: [Hp, Cp]  b2: [1, Cp] (f32)
    x = x_ref[...]
    h = jnp.dot(x, w1_ref[...], preferred_element_type=jnp.float32) + b1_ref[...]
    h = jnp.maximum(h, 0.0)                      # ReLU on the f32 accumulator
    if h.dtype != w2_ref.dtype:                  # bf16 path: narrow only the GEMM input
        h = h.astype(w2_ref.dtype)
    y = jnp.dot(h, w2_ref[...], preferred_element_type=jnp.float32) + b2_ref[...]
    out_ref[...] = y.astype(out_ref.dtype)


def _cls_head_kernel_ktiled(x_ref, w1_ref, b1_ref, w2_ref, b2_ref, out_ref, h_acc):
    # grid = (batch tiles, K tiles); K = reduction over H for the first GEMM,
    # last (innermost) grid axis.  h_acc: [TB, Hp] f32 scratch.
    k = pl.program_id(1)

    @pl.when(k == 0)
    def _():
        h_acc[...] = jnp.zeros_like(h_acc)

    h_acc[...] += jnp.dot(x_ref[...], w1_ref[...], preferred_element_type=jnp.float32)

    @pl.when(k == pl.num_programs(1) - 1)
    def _():
        h = jnp.maximum(h_acc[...] + b1_ref[...], 0.0)
        if h.dtype != w2_ref.dtype:
            h = h.astype(w2_ref.dtype)
        y = jnp.dot(h, w2_ref[...], preferred_element_type=jnp.float32) + b2_ref[...]
        out_ref[...] = y.astype(out_ref.dtype)


# ----------------------------------------------------------------------------
# Parameter prep (do ONCE at init time, not per call)
# ----------------------------------------------------------------------------
def pad_cls_head_params(w1_t, b1, w2_t, b2, *, compute_dtype=None):
    """Lane-pad (to multiples of 128) and optionally narrow the weights once.

    w1_t: [H, H], w2_t: [H, C] (nn.Linear weights pre-transposed to [in, out]).
    Biases are kept in f32 (they feed the f32 accumulator epilogue).
    """
    H = w1_t.shape[0]
    C = w2_t.shape[1]
    Hp = _round_up(H, 128)
    Cp = _round_up(C, 128)

    if compute_dtype is not None:
        w1_t = w1_t.astype(compute_dtype)
        w2_t = w2_t.astype(compute_dtype)

    def pad2(a, rows, cols):
        if a.shape == (rows, cols):
            return a                     # common 768/1024-style case: no copy at all
        return jnp.pad(a, ((0, rows - a.shape[0]), (0, cols - a.shape[1])))

    return {
        "w1": pad2(w1_t, Hp, Hp),
        "b1": pad2(b1.astype(jnp.float32).reshape(1, H), 1, Hp),
        "w2": pad2(w2_t, Hp, Cp),
        "b2": pad2(b2.astype(jnp.float32).reshape(1, C), 1, Cp),
        "H": H,
        "C": C,
    }


# ----------------------------------------------------------------------------
# Wrapper
# ----------------------------------------------------------------------------
def cls_head(cls_token, params, *, block_b=256, compute_dtype=None,
             k_tile=512, max_resident_weight_bytes=40 << 20):
    """cls_token: [B, H]. `params` from pad_cls_head_params. Returns [B, C] logits."""
    B, H = cls_token.shape
    assert H == params["H"], "hidden size mismatch"
    C = params["C"]
    w1_p, b1_p, w2_p, b2_p = params["w1"], params["b1"], params["w2"], params["b2"]
    Hp, Cp = w1_p.shape[0], w2_p.shape[1]
    out_dtype = cls_token.dtype

    if compute_dtype is not None:
        cls_token = cls_token.astype(compute_dtype)
        # Weights should already be stored narrow (pad_cls_head_params); cast only
        # as a fallback so mismatched calls still work.
        if w1_p.dtype != compute_dtype:
            w1_p = w1_p.astype(compute_dtype)
        if w2_p.dtype != compute_dtype:
            w2_p = w2_p.astype(compute_dtype)

    w_isz = jnp.dtype(w1_p.dtype).itemsize
    x_isz = jnp.dtype(cls_token.dtype).itemsize
    o_isz = jnp.dtype(out_dtype).itemsize

    # ---- batch (sublane) tiling --------------------------------------------
    sub = 16 if cls_token.dtype == jnp.bfloat16 else 8
    TB = _round_up(min(block_b, _round_up(B, sub)), sub)
    Bp = _round_up(B, TB)
    # Megacore: large (compute-bound) batches get >= 2 batch tiles so both v7x
    # TensorCores work; small batches stay single-tile (weight-DMA bound).
    if Bp // TB < 2 and B >= 256:
        TB = _round_up(-(-Bp // 2), sub)
        Bp = _round_up(B, TB)

    # x is the only per-call pad (weights were padded once at init).
    if cls_token.shape != (Bp, Hp):
        x_p = jnp.pad(cls_token, ((0, Bp - B), (0, Hp - H)))
    else:
        x_p = cls_token

    n_bt = Bp // TB
    weight_bytes = (Hp * Hp + Hp * Cp) * w_isz
    TK = min(_round_up(k_tile, 128), Hp)
    use_ktiled = (weight_bytes > max_resident_weight_bytes) and (Hp > TK)

    cost = pl.CostEstimate(
        flops=2 * B * H * (H + C),
        transcendentals=0,
        bytes_accessed=int(H * (H + C) * w_isz + B * H * x_isz
                           + B * C * o_isz + (H + C) * 4),
    )

    def build(buffered):
        w_bufs = 1 if buffered else 2

        def const_spec(shape):
            idx = lambda *_args: (0,) * len(shape)
            if buffered:
                # Constant index_map -> no re-DMA across grid steps; single
                # buffer halves the resident-weight VMEM footprint.
                return pl.BlockSpec(shape, idx, pipeline_mode=pl.Buffered(1))
            return pl.BlockSpec(shape, idx)

        if not use_ktiled:
            grid = (n_bt,)
            in_specs = [
                pl.BlockSpec((TB, Hp), lambda i: (i, 0)),
                const_spec((Hp, Hp)),
                const_spec((1, Hp)),
                const_spec((Hp, Cp)),
                const_spec((1, Cp)),
            ]
            out_spec = pl.BlockSpec((TB, Cp), lambda i: (i, 0))
            scratch = []
            kernel = _cls_head_kernel_resident
            semantics = ("parallel",)
            vmem = (2 * TB * Hp * x_isz + 2 * TB * Cp * o_isz
                    + weight_bytes * w_bufs + (Hp + Cp) * 4 * w_bufs
                    + TB * Hp * (4 + w_isz))
        else:
            n_kt = Hp // TK
            grid = (n_bt, n_kt)
            in_specs = [
                pl.BlockSpec((TB, TK), lambda i, k: (i, k)),
                pl.BlockSpec((TK, Hp), lambda i, k: (k, 0)),
                const_spec((1, Hp)),
                const_spec((Hp, Cp)),
                const_spec((1, Cp)),
            ]
            out_spec = pl.BlockSpec((TB, Cp), lambda i, k: (i, 0))
            scratch = [pltpu.VMEM((TB, Hp), jnp.float32)]
            kernel = _cls_head_kernel_ktiled
            semantics = ("parallel", "arbitrary")
            vmem = (2 * TB * TK * x_isz + 2 * TK * Hp * w_isz
                    + 2 * TB * Cp * o_isz
                    + Hp * Cp * w_isz * w_bufs + (Hp + Cp) * 4 * w_bufs
                    + TB * Hp * 4                    # f32 accumulator scratch
                    + TB * Hp * (4 + w_isz))         # epilogue temporaries
        vmem_limit = int(min(max(int(vmem * 1.3) + (1 << 20), 4 << 20), 64 << 20))

        return pl.pallas_call(
            kernel,
            out_shape=jax.ShapeDtypeStruct((Bp, Cp), out_dtype),
            grid=grid,
            in_specs=in_specs,
            out_specs=out_spec,
            scratch_shapes=scratch,
            compiler_params=pltpu.CompilerParams(
                dimension_semantics=semantics,
                vmem_limit_bytes=vmem_limit,
            ),
            cost_estimate=cost,
        )

    try:
        out_p = build(buffered=True)(x_p, w1_p, b1_p, w2_p, b2_p)
    except Exception:
        # Fallback if single-buffered pipeline_mode is rejected by this
        # toolchain; only cost is double-buffered resident weights.
        out_p = build(buffered=False)(x_p, w1_p, b1_p, w2_p, b2_p)

    # Slice away lane / sublane padding.
    return out_p[:B, :C]


def cls_head_ref(cls_token, w1_t, b1, w2_t, b2):
    h = jnp.maximum(cls_token @ w1_t + b1, 0.0)
    return h @ w2_t + b2


if __name__ == "__main__":
    # Small config consistent with the module: hidden_size=32, class_num=8, batch=2.
    B, H, C = 2, 32, 8

    key = jax.random.PRNGKey(0)
    k_x, k_w1, k_b1, k_w2, k_b2 = jax.random.split(key, 5)

    cls_token = jax.random.normal(k_x, (B, H), dtype=jnp.float32)
    # nn.Linear weights stored pre-transposed: [in, out].
    w1_t = jax.random.normal(k_w1, (H, H), dtype=jnp.float32) * 0.02
    b1 = jax.random.normal(k_b1, (H,), dtype=jnp.float32) * 0.02
    w2_t = jax.random.normal(k_w2, (H, C), dtype=jnp.float32) * 0.02
    b2 = jax.random.normal(k_b2, (C,), dtype=jnp.float32) * 0.02

    ref = cls_head_ref(cls_token, w1_t, b1, w2_t, b2)

    # Pad/prepare parameters ONCE (this is the per-call-pad fix from the review).
    params = pad_cls_head_params(w1_t, b1, w2_t, b2)

    # 1) f32 path (exact semantics of the PyTorch module).
    out = jax.block_until_ready(cls_head(cls_token, params))
    assert out.shape == (B, C)
    assert jnp.allclose(out, ref, atol=1e-5, rtol=1e-5), "f32 mismatch vs reference"

    # 2) Multi-tile batch path (grid > 1 with single-buffered resident weights).
    B2 = 20
    x2 = jax.random.normal(jax.random.PRNGKey(1), (B2, H), dtype=jnp.float32)
    out2 = jax.block_until_ready(cls_head(x2, params, block_b=8))
    ref2 = cls_head_ref(x2, w1_t, b1, w2_t, b2)
    assert out2.shape == (B2, C)
    assert jnp.allclose(out2, ref2, atol=1e-5, rtol=1e-5), "batched mismatch vs reference"

    # 3) bf16 compute path (recommended on v6e/v7x; also valid on v5e) with f32 accumulation.
    params_bf16 = pad_cls_head_params(w1_t, b1, w2_t, b2, compute_dtype=jnp.bfloat16)
    out_bf16 = jax.block_until_ready(
        cls_head(cls_token, params_bf16, compute_dtype=jnp.bfloat16))
    assert out_bf16.shape == (B, C)
    assert jnp.allclose(out_bf16, ref, atol=5e-3, rtol=5e-2), "bf16 mismatch vs reference"

    # 4) K-tiled fallback path (forced at small shapes to exercise the v7x large-H route).
    H3, B3 = 256, 24
    kk = jax.random.split(jax.random.PRNGKey(2), 5)
    x3 = jax.random.normal(kk[0], (B3, H3), dtype=jnp.float32)
    w1_3 = jax.random.normal(kk[1], (H3, H3), dtype=jnp.float32) * 0.02
    b1_3 = jax.random.normal(kk[2], (H3,), dtype=jnp.float32) * 0.02
    w2_3 = jax.random.normal(kk[3], (H3, C), dtype=jnp.float32) * 0.02
    b2_3 = jax.random.normal(kk[4], (C,), dtype=jnp.float32) * 0.02
    params3 = pad_cls_head_params(w1_3, b1_3, w2_3, b2_3)
    out3 = jax.block_until_ready(
        cls_head(x3, params3, block_b=8, k_tile=128, max_resident_weight_bytes=0))
    ref3 = cls_head_ref(x3, w1_3, b1_3, w2_3, b2_3)
    assert out3.shape == (B3, C)
    assert jnp.allclose(out3, ref3, atol=1e-4, rtol=1e-4), "k-tiled mismatch vs reference"

    print("KERNEL_OK")
</pallas_src>

<mosaic_0001>
module attributes {stable_mosaic.version = 11 : i64} {
  func.func @_cls_head_kernel_resident(%arg0: i32, %arg1: memref<8x128xf32, #tpu.memory_space<vmem>>, %arg2: memref<128x128xf32, #tpu.memory_space<vmem>>, %arg3: memref<1x128xf32, #tpu.memory_space<vmem>>, %arg4: memref<128x128xf32, #tpu.memory_space<vmem>>, %arg5: memref<1x128xf32, #tpu.memory_space<vmem>>, %arg6: memref<8x128xf32, #tpu.memory_space<vmem>>) attributes {dimension_semantics = [#tpu.dimension_semantics<parallel>], iteration_bounds = array<i64: 1>, scalar_prefetch = 0 : i64, scratch_operands = 0 : i64, tpu.core_type = #tpu.core_type<tc>, window_params = [{transform_indices = @transform_0, window_bounds = array<i64: 8, 128>}, {pipeline_mode = #tpu.pipeline_mode<synchronous>, transform_indices = @transform_1, window_bounds = array<i64: 128, 128>}, {pipeline_mode = #tpu.pipeline_mode<synchronous>, transform_indices = @transform_2, window_bounds = array<i64: 1, 128>}, {pipeline_mode = #tpu.pipeline_mode<synchronous>, transform_indices = @transform_3, window_bounds = array<i64: 128, 128>}, {pipeline_mode = #tpu.pipeline_mode<synchronous>, transform_indices = @transform_4, window_bounds = array<i64: 1, 128>}, {transform_indices = @transform_5, window_bounds = array<i64: 8, 128>}]} {
    %c0 = arith.constant 0 : index
    %c0_0 = arith.constant 0 : index
    %0 = vector.load %arg1[%c0, %c0_0] : memref<8x128xf32, #tpu.memory_space<vmem>>, vector<8x128xf32>
    %c0_1 = arith.constant 0 : index
    %c0_2 = arith.constant 0 : index
    %1 = vector.load %arg2[%c0_1, %c0_2] : memref<128x128xf32, #tpu.memory_space<vmem>>, vector<128x128xf32>
    %cst = arith.constant dense<0.000000e+00> : vector<8x128xf32>
    %2 = tpu.matmul %0, %1, %cst {dimension_numbers = #tpu.dot_dimension_numbers<[1], [0], [0], [1], [0, 0, 1, 1], [], []>} : vector<8x128xf32>, vector<128x128xf32>, vector<8x128xf32> -> vector<8x128xf32>
    %c0_3 = arith.constant 0 : index
    %c0_4 = arith.constant 0 : index
    %3 = vector.load %arg3[%c0_3, %c0_4] : memref<1x128xf32, #tpu.memory_space<vmem>>, vector<1x128xf32>
    %4 = vector.broadcast %3 : vector<1x128xf32> to vector<8x128xf32>
    %5 = arith.addf %2, %4 : vector<8x128xf32>
    %cst_5 = arith.constant 0.000000e+00 : f32
    %6 = vector.broadcast %cst_5 : f32 to vector<8x128xf32>
    %7 = arith.maximumf %5, %6 : vector<8x128xf32>
    %c0_6 = arith.constant 0 : index
    %c0_7 = arith.constant 0 : index
    %8 = vector.load %arg4[%c0_6, %c0_7] : memref<128x128xf32, #tpu.memory_space<vmem>>, vector<128x128xf32>
    %cst_8 = arith.constant dense<0.000000e+00> : vector<8x128xf32>
    %9 = tpu.matmul %7, %8, %cst_8 {dimension_numbers = #tpu.dot_dimension_numbers<[1], [0], [0], [1], [0, 0, 1, 1], [], []>} : vector<8x128xf32>, vector<128x128xf32>, vector<8x128xf32> -> vector<8x128xf32>
    %c0_9 = arith.constant 0 : index
    %c0_10 = arith.constant 0 : index
    %10 = vector.load %arg5[%c0_9, %c0_10] : memref<1x128xf32, #tpu.memory_space<vmem>>, vector<1x128xf32>
    %11 = vector.broadcast %10 : vector<1x128xf32> to vector<8x128xf32>
    %12 = arith.addf %9, %11 : vector<8x128xf32>
    %c0_11 = arith.constant 0 : index
    %c0_12 = arith.constant 0 : index
    %13 = vector.load %arg6[%c0_11, %c0_12] : memref<8x128xf32, #tpu.memory_space<vmem>>, vector<8x128xf32>
    tpu.vector_store %arg6[%c0_11, %c0_12], %12 {strides = array<i32>} : memref<8x128xf32, #tpu.memory_space<vmem>>, vector<8x128xf32>,
    return
  }
  func.func @transform_0(%arg0: i32) -> (i32, i32) {
    %c0_i32 = arith.constant 0 : i32
    %c0_i32_0 = arith.constant 0 : i32
    return %arg0, %c0_i32 : i32, i32
  }
  func.func @transform_1(%arg0: i32) -> (i32, i32) {
    %c0_i32 = arith.constant 0 : i32
    %c0_i32_0 = arith.constant 0 : i32
    %c0_i32_1 = arith.constant 0 : i32
    return %c0_i32, %c0_i32_0 : i32, i32
  }
  func.func @transform_2(%arg0: i32) -> (i32, i32) {
    %c0_i32 = arith.constant 0 : i32
    %c0_i32_0 = arith.constant 0 : i32
    %c0_i32_1 = arith.constant 0 : i32
    return %c0_i32, %c0_i32_0 : i32, i32
  }
  func.func @transform_3(%arg0: i32) -> (i32, i32) {
    %c0_i32 = arith.constant 0 : i32
    %c0_i32_0 = arith.constant 0 : i32
    %c0_i32_1 = arith.constant 0 : i32
    return %c0_i32, %c0_i32_0 : i32, i32
  }
  func.func @transform_4(%arg0: i32) -> (i32, i32) {
    %c0_i32 = arith.constant 0 : i32
    %c0_i32_0 = arith.constant 0 : i32
    %c0_i32_1 = arith.constant 0 : i32
    return %c0_i32, %c0_i32_0 : i32, i32
  }
  func.func @transform_5(%arg0: i32) -> (i32, i32) {
    %c0_i32 = arith.constant 0 : i32
    %c0_i32_0 = arith.constant 0 : i32
    return %arg0, %c0_i32 : i32, i32
  }
}

module attributes {stable_mosaic.version = 11 : i64} {
  func.func @_cls_head_kernel_resident(%arg0: i32, %arg1: memref<8x128xf32, #tpu.memory_space<vmem>>, %arg2: memref<128x128xf32, #tpu.memory_space<vmem>>, %arg3: memref<1x128xf32, #tpu.memory_space<vmem>>, %arg4: memref<128x128xf32, #tpu.memory_space<vmem>>, %arg5: memref<1x128xf32, #tpu.memory_space<vmem>>, %arg6: memref<8x128xf32, #tpu.memory_space<vmem>>) attributes {dimension_semantics = [#tpu.dimension_semantics<parallel>], iteration_bounds = array<i64: 1>, scalar_prefetch = 0 : i64, scratch_operands = 0 : i64, tpu.core_type = #tpu.core_type<tc>, window_params = [{transform_indices = @transform_0, window_bounds = array<i64: 8, 128>}, {pipeline_mode = #tpu.pipeline_mode<synchronous>, transform_indices = @transform_1, window_bounds = array<i64: 128, 128>}, {pipeline_mode = #tpu.pipeline_mode<synchronous>, transform_indices = @transform_2, window_bounds = array<i64: 1, 128>}, {pipeline_mode = #tpu.pipeline_mode<synchronous>, transform_indices = @transform_3, window_bounds = array<i64: 128, 128>}, {pipeline_mode = #tpu.pipeline_mode<synchronous>, transform_indices = @transform_4, window_bounds = array<i64: 1, 128>}, {transform_indices = @transform_5, window_bounds = array<i64: 8, 128>}]} {
    %c0 = arith.constant 0 : index
    %c0_0 = arith.constant 0 : index
    %0 = vector.load %arg1[%c0, %c0_0] : memref<8x128xf32, #tpu.memory_space<vmem>>, vector<8x128xf32>
    %c0_1 = arith.constant 0 : index
    %c0_2 = arith.constant 0 : index
    %1 = vector.load %arg2[%c0_1, %c0_2] : memref<128x128xf32, #tpu.memory_space<vmem>>, vector<128x128xf32>
    %cst = arith.constant dense<0.000000e+00> : vector<8x128xf32>
    %2 = tpu.matmul %0, %1, %cst {dimension_numbers = #tpu.dot_dimension_numbers<[1], [0], [0], [1], [0, 0, 1, 1], [], []>} : vector<8x128xf32>, vector<128x128xf32>, vector<8x128xf32> -> vector<8x128xf32>
    %c0_3 = arith.constant 0 : index
    %c0_4 = arith.constant 0 : index
    %3 = vector.load %arg3[%c0_3, %c0_4] : memref<1x128xf32, #tpu.memory_space<vmem>>, vector<1x128xf32>
    %4 = vector.broadcast %3 : vector<1x128xf32> to vector<8x128xf32>
    %5 = arith.addf %2, %4 : vector<8x128xf32>
    %cst_5 = arith.constant 0.000000e+00 : f32
    %6 = vector.broadcast %cst_5 : f32 to vector<8x128xf32>
    %7 = arith.maximumf %5, %6 : vector<8x128xf32>
    %c0_6 = arith.constant 0 : index
    %c0_7 = arith.constant 0 : index
    %8 = vector.load %arg4[%c0_6, %c0_7] : memref<128x128xf32, #tpu.memory_space<vmem>>, vector<128x128xf32>
    %cst_8 = arith.constant dense<0.000000e+00> : vector<8x128xf32>
    %9 = tpu.matmul %7, %8, %cst_8 {dimension_numbers = #tpu.dot_dimension_numbers<[1], [0], [0], [1], [0, 0, 1, 1], [], []>} : vector<8x128xf32>, vector<128x128xf32>, vector<8x128xf32> -> vector<8x128xf32>
    %c0_9 = arith.constant 0 : index
    %c0_10 = arith.constant 0 : index
    %10 = vector.load %arg5[%c0_9, %c0_10] : memref<1x128xf32, #tpu.memory_space<vmem>>, vector<1x128xf32>
    %11 = vector.broadcast %10 : vector<1x128xf32> to vector<8x128xf32>
    %12 = arith.addf %9, %11 : vector<8x128xf32>
    %c0_11 = arith.constant 0 : index
    %c0_12 = arith.constant 0 : index
    %13 = vector.load %arg6[%c0_11, %c0_12] : memref<8x128xf32, #tpu.memory_space<vmem>>, vector<8x128xf32>
    tpu.vector_store %arg6[%c0_11, %c0_12], %12 {strides = array<i32>} : memref<8x128xf32, #tpu.memory_space<vmem>>, vector<8x128xf32>,
    return
  }
  func.func @transform_0(%arg0: i32) -> (i32, i32) {
    %c0_i32 = arith.constant 0 : i32
    %c0_i32_0 = arith.constant 0 : i32
    return %arg0, %c0_i32 : i32, i32
  }
  func.func @transform_1(%arg0: i32) -> (i32, i32) {
    %c0_i32 = arith.constant 0 : i32
    %c0_i32_0 = arith.constant 0 : i32
    %c0_i32_1 = arith.constant 0 : i32
    return %c0_i32, %c0_i32_0 : i32, i32
  }
  func.func @transform_2(%arg0: i32) -> (i32, i32) {
    %c0_i32 = arith.constant 0 : i32
    %c0_i32_0 = arith.constant 0 : i32
    %c0_i32_1 = arith.constant 0 : i32
    return %c0_i32, %c0_i32_0 : i32, i32
  }
  func.func @transform_3(%arg0: i32) -> (i32, i32) {
    %c0_i32 = arith.constant 0 : i32
    %c0_i32_0 = arith.constant 0 : i32
    %c0_i32_1 = arith.constant 0 : i32
    return %c0_i32, %c0_i32_0 : i32, i32
  }
  func.func @transform_4(%arg0: i32) -> (i32, i32) {
    %c0_i32 = arith.constant 0 : i32
    %c0_i32_0 = arith.constant 0 : i32
    %c0_i32_1 = arith.constant 0 : i32
    return %c0_i32, %c0_i32_0 : i32, i32
  }
  func.func @transform_5(%arg0: i32) -> (i32, i32) {
    %c0_i32 = arith.constant 0 : i32
    %c0_i32_0 = arith.constant 0 : i32
    return %arg0, %c0_i32 : i32, i32
  }
}

</mosaic_0001>

<bundles_post_ra>
// kernel: tpu_custom_call.1
= control target key start
LH: loop header
LB: loop body
LE: loop exit
PB: predicated region body
PF: predicated region fallthrough
CT: control target
= control target key end

     0   :  { %10 = vsyncpa [#allocation3], 0  ;;  %s637_s0 = inlined_call_operand.hbm [shape: f32[8,128], index: 0, kind: input, shape index: {}]   ;;  %s638_s1 = inlined_call_operand.hbm [shape: f32[128,128], index: 1, kind: input, shape index: {}]   ;;  %s639_s2 = inlined_call_operand.vmem [shape: f32[1,128], index: 2, kind: input, shape index: {}]   ;;  %s640_s3 = inlined_call_operand.hbm [shape: f32[128,128], index: 3, kind: input, shape index: {}]   ;;  %s641_s4 = inlined_call_operand.vmem [shape: f32[1,128], index: 4, kind: input, shape index: {}]   ;;  %s642_s5 = inlined_call_operand.hbm [shape: f32[8,128], index: 5, kind: output, shape index: {}]  }
   0x1   :  { %11 = vsyncpa [#allocation6], 0 }
   0x2   :  { %12 = vsyncpa [#allocation4], 0  ;;  %s522_s18 = smov [#allocation5]   ;;  %s428_s22 = scalar_lea.hbm %s638_s1, 2048 }
   0x3   :  { %s28_s19 = sshll.u32 %s522_s18, 4  ;;  %p429_p0 = scmp.ne.s32.totalorder %s638_s1, %s428_s22  ;;  %s29_s19 = int_to_ptr.vmem [resolvable:$true] %s28_s19 }
   0x4   :  { %p432_p1 = scmp.lt.u32.totalorder %s428_s22, %s638_s1 }
   0x6   :  { %p434_p2 = pnand %p432_p1, %p429_p0 }
   0x8   :  { %437 = shalt.err (!%p434_p2)
}
   0x9   :  { %s438_s27 = scalar_lea.vmem %s29_s19, 2048  ;;  %p443_p4 = scmp.lt.s32.totalorder %s29_s19, %s29_s19 }
   0xa   :  { %p439_p3 = scmp.ne.s32.totalorder %s29_s19, %s438_s27  ;;  %p444_p5 = scmp.lt.s32.totalorder %s438_s27, %s438_s27 }
   0xc   :  { %p445_p6 = por %p444_p5, %p443_p4 }
   0xe   :  { %p446_p7 = pnand %p445_p6, %p439_p3 }
  0x10   :  { %449 = shalt.err (!%p446_p7)
}
  0x11   :  { %s523_s28 = smov 128   ;;  %s524_s29 = smov 8  }
  0x12   :  { %34 = dma.hbm_to_vmem [thread:$0]  %s638_s1, 2048, %s29_s19, [#allocation6], %s523_s28, %s523_s28, %s524_s29  }
  0x13   :  { %s525_s7 = smov [#allocation2]   ;;  %s526_s9 = smov [#allocation7]  }
  0x14   :  { %s19_s8 = sshll.u32 %s525_s7, 4  ;;  %s42_s10 = sshll.u32 %s526_s9, 4  ;;  %s20_s8 = int_to_ptr.vmem [resolvable:$true] %s19_s8  ;;  %s43_s10 = int_to_ptr.vmem [resolvable:$true] %s42_s10 }
  0x15   :  { %s450_s13 = scalar_lea.hbm %s637_s0, 128 }
  0x16   :  { %p451_p8 = scmp.ne.s32.totalorder %s637_s0, %s450_s13  ;;  %p454_p9 = scmp.lt.u32.totalorder %s450_s13, %s637_s0 }
  0x18   :  { %p456_p10 = pnand %p454_p9, %p451_p8 }
  0x1a   :  { %459 = shalt.err (!%p456_p10)
}
  0x1b   :  { %s460_s1 = scalar_lea.vmem %s20_s8, 128  ;;  %p465_p12 = scmp.lt.s32.totalorder %s20_s8, %s20_s8 }
  0x1c   :  { %p461_p11 = scmp.ne.s32.totalorder %s20_s8, %s460_s1  ;;  %p466_p13 = scmp.lt.s32.totalorder %s460_s1, %s460_s1 }
  0x1e   :  { %p467_p0 = por %p466_p13, %p465_p12 }
  0x20   :  { %p468_p1 = pnand %p467_p0, %p461_p11 }
  0x22   :  { %471 = shalt.err (!%p468_p1)
}
  0x23   :  { %22 = dma.hbm_to_vmem [thread:$0]  %s637_s0, 128, %s20_s8, [#allocation3]  }
  0x24   :  { %s472_s22 = scalar_lea.hbm %s640_s3, 2048 }
  0x25   :  { %p473_p2 = scmp.ne.s32.totalorder %s640_s3, %s472_s22  ;;  %p476_p3 = scmp.lt.u32.totalorder %s472_s22, %s640_s3 }
  0x27   :  { %p478_p4 = pnand %p476_p3, %p473_p2 }
  0x29   :  { %481 = shalt.err (!%p478_p4)
}
  0x2a   :  { %s482_s27 = scalar_lea.vmem %s43_s10, 2048  ;;  %p487_p6 = scmp.lt.s32.totalorder %s43_s10, %s43_s10 }
  0x2b   :  { %p483_p5 = scmp.ne.s32.totalorder %s43_s10, %s482_s27  ;;  %p488_p7 = scmp.lt.s32.totalorder %s482_s27, %s482_s27 }
  0x2d   :  { %p489_p8 = por %p488_p7, %p487_p6 }
  0x2f   :  { %p490_p9 = pnand %p489_p8, %p483_p5 }
  0x31   :  { %493 = shalt.err (!%p490_p9)
}
  0x32   :  { %48 = dma.hbm_to_vmem [thread:$0]  %s640_s3, 2048, %s43_s10, [#allocation6], %s523_s28, %s523_s28, %s524_s29  }
  0x33   :  { %516 = dma.done.wait [#allocation3], 128  }
  0x34   :  { %517 = vsyncadd [#allocation3], 4294967168 }
  0x35   :  { %518 = dma.done.wait [#allocation6], 4096  }
  0x36   :  { %519 = vsyncadd [#allocation6], 4294963200  ;;  %v527_v0 = vmov 0.0|0.0   ;;  %vm528_vm0 = vmmov 0   ;;  %v529_v1 = vmov 0.0   ;;  %v61_v2 = vld [vmem:[#allocation5] sm:$0xff] }
  0x37   :  { %371 = vmatprep.subr.bf16.mxu0 %v527_v0  ;;  %333 = vmatprep.mubr.msk.f32.mxu0 %vm528_vm0, %v529_v1  ;;  %v62_v3 = vld [vmem:[#allocation5 + $0x8] sm:$0xff]  ;;  %v63_v4 = vld [vmem:[#allocation5 + $0x10] sm:$0xff]  ;;  %v64_v6 = vld [vmem:[#allocation5 + $0x18] sm:$0xff]  ;;  %s530_s7 = smov [#allocation8]  }
  0x38   :  { %395 = vmatprep.subr.bf16.mxu1 %v527_v0  ;;  %368 = vmatprep.mubr.msk.f32.mxu1 %vm528_vm0, %v529_v1  ;;  %v372_v5 = vpack.c.bf16 %v62_v3, %v61_v2  ;;  %v375_v7 = vpack.c.bf16 %v64_v6, %v63_v4  ;;  %v65_v8 = vld [vmem:[#allocation5 + $0x20] sm:$0xff]  ;;  %v66_v9 = vld [vmem:[#allocation5 + $0x28] sm:$0xff]  ;;  %v157_v12 = vld [vmem:[#allocation7 + $0x10] sm:$0xff]  ;;  %s255_s8 = sshll.u32 %s530_s7, 4  ;;  %s256_s8 = int_to_ptr.vmem [resolvable:$true] %s255_s8 }
  0x39   :  { %v155_v10 = vld [vmem:[#allocation7] sm:$0xff]  ;;  %v156_v11 = vld [vmem:[#allocation7 + $0x8] sm:$0xff]  ;;  %v158_v13 = vld [vmem:[#allocation7 + $0x18] sm:$0xff]  ;;  %v378_v14 = vpack.c.bf16 %v66_v9, %v65_v8  ;;  %s494_s9 = scalar_lea.vmem %s256_s8, 128  ;;  %p499_p11 = scmp.lt.s32.totalorder %s256_s8, %s256_s8 }
  0x3a   :  { %373 = vmatpush3.bf16.msra.mxu0 %v372_v5  ;;  %v396_v15 = vpack.c.bf16 %v156_v11, %v155_v10  ;;  %v67_v16 = vld [vmem:[#allocation5 + $0x30] sm:$0xff]  ;;  %v68_v17 = vld [vmem:[#allocation5 + $0x38] sm:$0xff]  ;;  %v399_v18 = vpack.c.bf16 %v158_v13, %v157_v12  ;;  %v159_v19 = vld [vmem:[#allocation7 + $0x20] sm:$0xff]  ;;  %p495_p10 = scmp.ne.s32.totalorder %s256_s8, %s494_s9  ;;  %p500_p12 = scmp.lt.s32.totalorder %s494_s9, %s494_s9 }
  0x3b   :  { %374 = vmatprep.subr.bf16.mxu0 %v527_v0  ;;  %v160_v20 = vld [vmem:[#allocation7 + $0x28] sm:$0xff]  ;;  %v381_v21 = vpack.c.bf16 %v68_v17, %v67_v16  ;;  %v69_v22 = vld [vmem:[#allocation5 + $0x40] sm:$0xff]  ;;  %v161_v25 = vld [vmem:[#allocation7 + $0x30] sm:$0xff] }
  0x3c   :  { %397 = vmatpush3.bf16.msra.mxu1 %v396_v15  ;;  %v70_v23 = vld [vmem:[#allocation5 + $0x48] sm:$0xff]  ;;  %v402_v24 = vpack.c.bf16 %v160_v20, %v159_v19  ;;  %v162_v26 = vld [vmem:[#allocation7 + $0x38] sm:$0xff]  ;;  %v71_v28 = vld [vmem:[#allocation5 + $0x50] sm:$0xff]  ;;  %p501_p13 = por %p500_p12, %p499_p11 }
  0x3d   :  { %398 = vmatprep.subr.bf16.mxu1 %v527_v0  ;;  %v384_v27 = vpack.c.bf16 %v70_v23, %v69_v22  ;;  %v72_v29 = vld [vmem:[#allocation5 + $0x58] sm:$0xff]  ;;  %v405_v30 = vpack.c.bf16 %v162_v26, %v161_v25  ;;  %v163_v31 = vld [vmem:[#allocation7 + $0x40] sm:$0xff]  ;;  %v164_v32 = vld [vmem:[#allocation7 + $0x48] sm:$0xff] }
  0x3e   :  { %376 = vmatpush3.bf16.msra.mxu0 %v375_v7  ;;  %v387_v33 = vpack.c.bf16 %v72_v29, %v71_v28  ;;  %v73_v34 = vld [vmem:[#allocation5 + $0x60] sm:$0xff]  ;;  %v74_v35 = vld [vmem:[#allocation5 + $0x68] sm:$0xff]  ;;  %v408_v36 = vpack.c.bf16 %v164_v32, %v163_v31  ;;  %v165_v37 = vld [vmem:[#allocation7 + $0x50] sm:$0xff]  ;;  %p502_p0 = pnand %p501_p13, %p495_p10 }
  0x3f   :  { %377 = vmatprep.subr.bf16.mxu0 %v527_v0  ;;  %v166_v38 = vld [vmem:[#allocation7 + $0x58] sm:$0xff]  ;;  %v390_v39 = vpack.c.bf16 %v74_v35, %v73_v34  ;;  %v75_v40 = vld [vmem:[#allocation5 + $0x70] sm:$0xff]  ;;  %v167_v43 = vld [vmem:[#allocation7 + $0x60] sm:$0xff] }
  0x40   :  { %400 = vmatpush3.bf16.msra.mxu1 %v399_v18  ;;  %v76_v41 = vld [vmem:[#allocation5 + $0x78] sm:$0xff]  ;;  %v411_v42 = vpack.c.bf16 %v166_v38, %v165_v37  ;;  %v168_v44 = vld [vmem:[#allocation7 + $0x68] sm:$0xff]  ;;  %v169_v48 = vld [vmem:[#allocation7 + $0x70] sm:$0xff] }
  0x41   :  { %401 = vmatprep.subr.bf16.mxu1 %v527_v0  ;;  %v393_v45 = vpack.c.bf16 %v76_v41, %v75_v40  ;;  %v414_v46 = vpack.c.bf16 %v168_v44, %v167_v43  ;;  %v60_v47 = vld [vmem:[#allocation2] sm:$0xff] }
  0x42   :  { %379 = vmatpush3.bf16.msra.mxu0 %v378_v14  ;;  %v170_v49 = vld [vmem:[#allocation7 + $0x78] sm:$0xff] }
  0x43   :  { %380 = vmatprep.subr.bf16.mxu0 %v527_v0  ;;  %v417_v50 = vpack.c.bf16 %v170_v49, %v169_v48  ;;  %v265_v51 = vld [vmem:[%s639_s2] ss:$0 sm:$0xff] }
  0x44   :  { %403 = vmatpush3.bf16.msra.mxu1 %v402_v24  ;;  %v266_v56 = vld [vmem:[%s641_s4] ss:$0 sm:$0xff] }
  0x45   :  { %404 = vmatprep.subr.bf16.mxu1 %v527_v0 }
  0x46   :  { %382 = vmatpush3.bf16.msra.mxu0 %v381_v21 }
  0x47   :  { %383 = vmatprep.subr.bf16.mxu0 %v527_v0 }
  0x48   :  { %406 = vmatpush3.bf16.msra.mxu1 %v405_v30 }
  0x49   :  { %407 = vmatprep.subr.bf16.mxu1 %v527_v0 }
  0x4a   :  { %385 = vmatpush3.bf16.msra.mxu0 %v384_v27 }
  0x4b   :  { %386 = vmatprep.subr.bf16.mxu0 %v527_v0 }
  0x4c   :  { %409 = vmatpush3.bf16.msra.mxu1 %v408_v36 }
  0x4d   :  { %410 = vmatprep.subr.bf16.mxu1 %v527_v0 }
  0x4e   :  { %388 = vmatpush3.bf16.msra.mxu0 %v387_v33 }
  0x4f   :  { %389 = vmatprep.subr.bf16.mxu0 %v527_v0 }
  0x50   :  { %412 = vmatpush3.bf16.msra.mxu1 %v411_v42 }
  0x51   :  { %413 = vmatprep.subr.bf16.mxu1 %v527_v0 }
  0x52   :  { %391 = vmatpush3.bf16.msra.mxu0 %v390_v39 }
  0x53   :  { %392 = vmatprep.subr.bf16.mxu0 %v527_v0 }
  0x54   :  { %415 = vmatpush3.bf16.msra.mxu1 %v414_v46 }
  0x55   :  { %416 = vmatprep.subr.bf16.mxu1 %v527_v0 }
  0x56   :  { %394 = vmatpush3.bf16.msra.mxu0 %v393_v45 }
  0x58   :  { %418 = vmatpush3.bf16.msra.mxu1 %v417_v50 }
  0x59   :  { %334 = vmatmul.mubr.f32.vlgmr.msra.gmra.mrb[0].mxu0 %v60_v47 }
 0x12c   :  { %v150_v52 = vpop.f32.mrb[0].mxu0 }
 0x12d   :  { %v151_v53 = vadd.f32 %v265_v51, %v150_v52  ;;  %v335_v54 = vpop.f32.mrb[1].mxu0 }
 0x12f   :  { %v154_v55 = vmax.f32 %v151_v53, 0.0 }
 0x131   :  { %369 = vmatmul.mubr.f32.vlgmr.msra.gmra.mrb[0].mxu1 %v154_v55 }
 0x204   :  { %v244_v57 = vpop.f32.mrb[0].mxu1 }
 0x205   :  { %v245_v58 = vadd.f32 %v266_v56, %v244_v57  ;;  %v370_v59 = vpop.f32.mrb[1].mxu1 }
 0x207   :  { %248 = vst [vmem:[#allocation8] sm:$0xff] %v245_v58 }
 0x208   :  { %505 = shalt.err (!%p502_p0)
}
 0x209   :  { %s506_s11 = scalar_lea.hbm %s642_s5, 128 }
 0x20a   :  { %p507_p1 = scmp.ne.s32.totalorder %s642_s5, %s506_s11  ;;  %p510_p2 = scmp.lt.u32.totalorder %s506_s11, %s642_s5 }
 0x20c   :  { %p512_p3 = pnand %p510_p2, %p507_p1 }
 0x20e   :  { %515 = shalt.err (!%p512_p3)
}
 0x20f   :  { %258 = dma.vmem_to_hbm [thread:$0]  %s256_s8, 128, %s642_s5, [#allocation4]  }
 0x210   :  { %520 = dma.done.wait [#allocation4], 128  }
 0x211   :  { %521 = vsyncadd [#allocation4], 4294967168 }
 0x212   :  { %262 = vsyncpa [#allocation3], 1 }
 0x213   :  { %263 = vsyncpa [#allocation6], 1 }
 0x214   :  { %264 = vsyncpa [#allocation4], 1 }

// kernel: tpu_custom_call.1
= control target key start
LH: loop header
LB: loop body
LE: loop exit
PB: predicated region body
PF: predicated region fallthrough
CT: control target
= control target key end

     0   :  { %10 = vsyncpa [#allocation3], 0  ;;  %s637_s0 = inlined_call_operand.hbm [shape: f32[8,128], index: 0, kind: input, shape index: {}]   ;;  %s638_s1 = inlined_call_operand.hbm [shape: f32[128,128], index: 1, kind: input, shape index: {}]   ;;  %s639_s2 = inlined_call_operand.vmem [shape: f32[1,128], index: 2, kind: input, shape index: {}]   ;;  %s640_s3 = inlined_call_operand.hbm [shape: f32[128,128], index: 3, kind: input, shape index: {}]   ;;  %s641_s4 = inlined_call_operand.vmem [shape: f32[1,128], index: 4, kind: input, shape index: {}]   ;;  %s642_s5 = inlined_call_operand.hbm [shape: f32[8,128], index: 5, kind: output, shape index: {}]  }
   0x1   :  { %11 = vsyncpa [#allocation6], 0 }
   0x2   :  { %12 = vsyncpa [#allocation4], 0  ;;  %s522_s18 = smov [#allocation5]   ;;  %s428_s22 = scalar_lea.hbm %s638_s1, 2048 }
   0x3   :  { %s28_s19 = sshll.u32 %s522_s18, 4  ;;  %p429_p0 = scmp.ne.s32.totalorder %s638_s1, %s428_s22  ;;  %s29_s19 = int_to_ptr.vmem [resolvable:$true] %s28_s19 }
   0x4   :  { %p432_p1 = scmp.lt.u32.totalorder %s428_s22, %s638_s1 }
   0x6   :  { %p434_p2 = pnand %p432_p1, %p429_p0 }
   0x8   :  { %437 = shalt.err (!%p434_p2)
}
   0x9   :  { %s438_s27 = scalar_lea.vmem %s29_s19, 2048  ;;  %p443_p4 = scmp.lt.s32.totalorder %s29_s19, %s29_s19 }
   0xa   :  { %p439_p3 = scmp.ne.s32.totalorder %s29_s19, %s438_s27  ;;  %p444_p5 = scmp.lt.s32.totalorder %s438_s27, %s438_s27 }
   0xc   :  { %p445_p6 = por %p444_p5, %p443_p4 }
   0xe   :  { %p446_p7 = pnand %p445_p6, %p439_p3 }
  0x10   :  { %449 = shalt.err (!%p446_p7)
}
  0x11   :  { %s523_s28 = smov 128   ;;  %s524_s29 = smov 8  }
  0x12   :  { %34 = dma.hbm_to_vmem [thread:$0]  %s638_s1, 2048, %s29_s19, [#allocation6], %s523_s28, %s523_s28, %s524_s29  }
  0x13   :  { %s525_s7 = smov [#allocation2]   ;;  %s526_s9 = smov [#allocation7]  }
  0x14   :  { %s19_s8 = sshll.u32 %s525_s7, 4  ;;  %s42_s10 = sshll.u32 %s526_s9, 4  ;;  %s20_s8 = int_to_ptr.vmem [resolvable:$true] %s19_s8  ;;  %s43_s10 = int_to_ptr.vmem [resolvable:$true] %s42_s10 }
  0x15   :  { %s450_s13 = scalar_lea.hbm %s637_s0, 128 }
  0x16   :  { %p451_p8 = scmp.ne.s32.totalorder %s637_s0, %s450_s13  ;;  %p454_p9 = scmp.lt.u32.totalorder %s450_s13, %s637_s0 }
  0x18   :  { %p456_p10 = pnand %p454_p9, %p451_p8 }
  0x1a   :  { %459 = shalt.err (!%p456_p10)
}
  0x1b   :  { %s460_s1 = scalar_lea.vmem %s20_s8, 128  ;;  %p465_p12 = scmp.lt.s32.totalorder %s20_s8, %s20_s8 }
  0x1c   :  { %p461_p11 = scmp.ne.s32.totalorder %s20_s8, %s460_s1  ;;  %p466_p13 = scmp.lt.s32.totalorder %s460_s1, %s460_s1 }
  0x1e   :  { %p467_p0 = por %p466_p13, %p465_p12 }
  0x20   :  { %p468_p1 = pnand %p467_p0, %p461_p11 }
  0x22   :  { %471 = shalt.err (!%p468_p1)
}
  0x23   :  { %22 = dma.hbm_to_vmem [thread:$0]  %s637_s0, 128, %s20_s8, [#allocation3]  }
  0x24   :  { %s472_s22 = scalar_lea.hbm %s640_s3, 2048 }
  0x25   :  { %p473_p2 = scmp.ne.s32.totalorder %s640_s3, %s472_s22  ;;  %p476_p3 = scmp.lt.u32.totalorder %s472_s22, %s640_s3 }
  0x27   :  { %p478_p4 = pnand %p476_p3, %p473_p2 }
  0x29   :  { %481 = shalt.err (!%p478_p4)
}
  0x2a   :  { %s482_s27 = scalar_lea.vmem %s43_s10, 2048  ;;  %p487_p6 = scmp.lt.s32.totalorder %s43_s10, %s43_s10 }
  0x2b   :  { %p483_p5 = scmp.ne.s32.totalorder %s43_s10, %s482_s27  ;;  %p488_p7 = scmp.lt.s32.totalorder %s482_s27, %s482_s27 }
  0x2d   :  { %p489_p8 = por %p488_p7, %p487_p6 }
  0x2f   :  { %p490_p9 = pnand %p489_p8, %p483_p5 }
  0x31   :  { %493 = shalt.err (!%p490_p9)
}
  0x32   :  { %48 = dma.hbm_to_vmem [thread:$0]  %s640_s3, 2048, %s43_s10, [#allocation6], %s523_s28, %s523_s28, %s524_s29  }
  0x33   :  { %516 = dma.done.wait [#allocation3], 128  }
  0x34   :  { %517 = vsyncadd [#allocation3], 4294967168 }
  0x35   :  { %518 = dma.done.wait [#allocation6], 4096  }
  0x36   :  { %519 = vsyncadd [#allocation6], 4294963200  ;;  %v527_v0 = vmov 0.0|0.0   ;;  %vm528_vm0 = vmmov 0   ;;  %v529_v1 = vmov 0.0   ;;  %v61_v2 = vld [vmem:[#allocation5] sm:$0xff] }
  0x37   :  { %371 = vmatprep.subr.bf16.mxu0 %v527_v0  ;;  %333 = vmatprep.mubr.msk.f32.mxu0 %vm528_vm0, %v529_v1  ;;  %v62_v3 = vld [vmem:[#allocation5 + $0x8] sm:$0xff]  ;;  %v63_v4 = vld [vmem:[#allocation5 + $0x10] sm:$0xff]  ;;  %v64_v6 = vld [vmem:[#allocation5 + $0x18] sm:$0xff]  ;;  %s530_s7 = smov [#allocation8]  }
  0x38   :  { %395 = vmatprep.subr.bf16.mxu1 %v527_v0  ;;  %368 = vmatprep.mubr.msk.f32.mxu1 %vm528_vm0, %v529_v1  ;;  %v372_v5 = vpack.c.bf16 %v62_v3, %v61_v2  ;;  %v375_v7 = vpack.c.bf16 %v64_v6, %v63_v4  ;;  %v65_v8 = vld [vmem:[#allocation5 + $0x20] sm:$0xff]  ;;  %v66_v9 = vld [vmem:[#allocation5 + $0x28] sm:$0xff]  ;;  %v157_v12 = vld [vmem:[#allocation7 + $0x10] sm:$0xff]  ;;  %s255_s8 = sshll.u32 %s530_s7, 4  ;;  %s256_s8 = int_to_ptr.vmem [resolvable:$true] %s255_s8 }
  0x39   :  { %v155_v10 = vld [vmem:[#allocation7] sm:$0xff]  ;;  %v156_v11 = vld [vmem:[#allocation7 + $0x8] sm:$0xff]  ;;  %v158_v13 = vld [vmem:[#allocation7 + $0x18] sm:$0xff]  ;;  %v378_v14 = vpack.c.bf16 %v66_v9, %v65_v8  ;;  %s494_s9 = scalar_lea.vmem %s256_s8, 128  ;;  %p499_p11 = scmp.lt.s32.totalorder %s256_s8, %s256_s8 }
  0x3a   :  { %373 = vmatpush3.bf16.msra.mxu0 %v372_v5  ;;  %v396_v15 = vpack.c.bf16 %v156_v11, %v155_v10  ;;  %v67_v16 = vld [vmem:[#allocation5 + $0x30] sm:$0xff]  ;;  %v68_v17 = vld [vmem:[#allocation5 + $0x38] sm:$0xff]  ;;  %v399_v18 = vpack.c.bf16 %v158_v13, %v157_v12  ;;  %v159_v19 = vld [vmem:[#allocation7 + $0x20] sm:$0xff]  ;;  %p495_p10 = scmp.ne.s32.totalorder %s256_s8, %s494_s9  ;;  %p500_p12 = scmp.lt.s32.totalorder %s494_s9, %s494_s9 }
  0x3b   :  { %374 = vmatprep.subr.bf16.mxu0 %v527_v0  ;;  %v160_v20 = vld [vmem:[#allocation7 + $0x28] sm:$0xff]  ;;  %v381_v21 = vpack.c.bf16 %v68_v17, %v67_v16  ;;  %v69_v22 = vld [vmem:[#allocation5 + $0x40] sm:$0xff]  ;;  %v161_v25 = vld [vmem:[#allocation7 + $0x30] sm:$0xff] }
  0x3c   :  { %397 = vmatpush3.bf16.msra.mxu1 %v396_v15  ;;  %v70_v23 = vld [vmem:[#allocation5 + $0x48] sm:$0xff]  ;;  %v402_v24 = vpack.c.bf16 %v160_v20, %v159_v19  ;;  %v162_v26 = vld [vmem:[#allocation7 + $0x38] sm:$0xff]  ;;  %v71_v28 = vld [vmem:[#allocation5 + $0x50] sm:$0xff]  ;;  %p501_p13 = por %p500_p12, %p499_p11 }
  0x3d   :  { %398 = vmatprep.subr.bf16.mxu1 %v527_v0  ;;  %v384_v27 = vpack.c.bf16 %v70_v23, %v69_v22  ;;  %v72_v29 = vld [vmem:[#allocation5 + $0x58] sm:$0xff]  ;;  %v405_v30 = vpack.c.bf16 %v162_v26, %v161_v25  ;;  %v163_v31 = vld [vmem:[#allocation7 + $0x40] sm:$0xff]  ;;  %v164_v32 = vld [vmem:[#allocation7 + $0x48] sm:$0xff] }
  0x3e   :  { %376 = vmatpush3.bf16.msra.mxu0 %v375_v7  ;;  %v387_v33 = vpack.c.bf16 %v72_v29, %v71_v28  ;;  %v73_v34 = vld [vmem:[#allocation5 + $0x60] sm:$0xff]  ;;  %v74_v35 = vld [vmem:[#allocation5 + $0x68] sm:$0xff]  ;;  %v408_v36 = vpack.c.bf16 %v164_v32, %v163_v31  ;;  %v165_v37 = vld [vmem:[#allocation7 + $0x50] sm:$0xff]  ;;  %p502_p0 = pnand %p501_p13, %p495_p10 }
  0x3f   :  { %377 = vmatprep.subr.bf16.mxu0 %v527_v0  ;;  %v166_v38 = vld [vmem:[#allocation7 + $0x58] sm:$0xff]  ;;  %v390_v39 = vpack.c.bf16 %v74_v35, %v73_v34  ;;  %v75_v40 = vld [vmem:[#allocation5 + $0x70] sm:$0xff]  ;;  %v167_v43 = vld [vmem:[#allocation7 + $0x60] sm:$0xff] }
  0x40   :  { %400 = vmatpush3.bf16.msra.mxu1 %v399_v18  ;;  %v76_v41 = vld [vmem:[#allocation5 + $0x78] sm:$0xff]  ;;  %v411_v42 = vpack.c.bf16 %v166_v38, %v165_v37  ;;  %v168_v44 = vld [vmem:[#allocation7 + $0x68] sm:$0xff]  ;;  %v169_v48 = vld [vmem:[#allocation7 + $0x70] sm:$0xff] }
  0x41   :  { %401 = vmatprep.subr.bf16.mxu1 %v527_v0  ;;  %v393_v45 = vpack.c.bf16 %v76_v41, %v75_v40  ;;  %v414_v46 = vpack.c.bf16 %v168_v44, %v167_v43  ;;  %v60_v47 = vld [vmem:[#allocation2] sm:$0xff] }
  0x42   :  { %379 = vmatpush3.bf16.msra.mxu0 %v378_v14  ;;  %v170_v49 = vld [vmem:[#allocation7 + $0x78] sm:$0xff] }
  0x43   :  { %380 = vmatprep.subr.bf16.mxu0 %v527_v0  ;;  %v417_v50 = vpack.c.bf16 %v170_v49, %v169_v48  ;;  %v265_v51 = vld [vmem:[%s639_s2] ss:$0 sm:$0xff] }
  0x44   :  { %403 = vmatpush3.bf16.msra.mxu1 %v402_v24  ;;  %v266_v56 = vld [vmem:[%s641_s4] ss:$0 sm:$0xff] }
  0x45   :  { %404 = vmatprep.subr.bf16.mxu1 %v527_v0 }
  0x46   :  { %382 = vmatpush3.bf16.msra.mxu0 %v381_v21 }
  0x47   :  { %383 = vmatprep.subr.bf16.mxu0 %v527_v0 }
  0x48   :  { %406 = vmatpush3.bf16.msra.mxu1 %v405_v30 }
  0x49   :  { %407 = vmatprep.subr.bf16.mxu1 %v527_v0 }
  0x4a   :  { %385 = vmatpush3.bf16.msra.mxu0 %v384_v27 }
  0x4b   :  { %386 = vmatprep.subr.bf16.mxu0 %v527_v0 }
  0x4c   :  { %409 = vmatpush3.bf16.msra.mxu1 %v408_v36 }
  0x4d   :  { %410 = vmatprep.subr.bf16.mxu1 %v527_v0 }
  0x4e   :  { %388 = vmatpush3.bf16.msra.mxu0 %v387_v33 }
  0x4f   :  { %389 = vmatprep.subr.bf16.mxu0 %v527_v0 }
  0x50   :  { %412 = vmatpush3.bf16.msra.mxu1 %v411_v42 }
  0x51   :  { %413 = vmatprep.subr.bf16.mxu1 %v527_v0 }
  0x52   :  { %391 = vmatpush3.bf16.msra.mxu0 %v390_v39 }
  0x53   :  { %392 = vmatprep.subr.bf16.mxu0 %v527_v0 }
  0x54   :  { %415 = vmatpush3.bf16.msra.mxu1 %v414_v46 }
  0x55   :  { %416 = vmatprep.subr.bf16.mxu1 %v527_v0 }
  0x56   :  { %394 = vmatpush3.bf16.msra.mxu0 %v393_v45 }
  0x58   :  { %418 = vmatpush3.bf16.msra.mxu1 %v417_v50 }
  0x59   :  { %334 = vmatmul.mubr.f32.vlgmr.msra.gmra.mrb[0].mxu0 %v60_v47 }
 0x12c   :  { %v150_v52 = vpop.f32.mrb[0].mxu0 }
 0x12d   :  { %v151_v53 = vadd.f32 %v265_v51, %v150_v52  ;;  %v335_v54 = vpop.f32.mrb[1].mxu0 }
 0x12f   :  { %v154_v55 = vmax.f32 %v151_v53, 0.0 }
 0x131   :  { %369 = vmatmul.mubr.f32.vlgmr.msra.gmra.mrb[0].mxu1 %v154_v55 }
 0x204   :  { %v244_v57 = vpop.f32.mrb[0].mxu1 }
 0x205   :  { %v245_v58 = vadd.f32 %v266_v56, %v244_v57  ;;  %v370_v59 = vpop.f32.mrb[1].mxu1 }
 0x207   :  { %248 = vst [vmem:[#allocation8] sm:$0xff] %v245_v58 }
 0x208   :  { %505 = shalt.err (!%p502_p0)
}
 0x209   :  { %s506_s11 = scalar_lea.hbm %s642_s5, 128 }
 0x20a   :  { %p507_p1 = scmp.ne.s32.totalorder %s642_s5, %s506_s11  ;;  %p510_p2 = scmp.lt.u32.totalorder %s506_s11, %s642_s5 }
 0x20c   :  { %p512_p3 = pnand %p510_p2, %p507_p1 }
 0x20e   :  { %515 = shalt.err (!%p512_p3)
}
 0x20f   :  { %258 = dma.vmem_to_hbm [thread:$0]  %s256_s8, 128, %s642_s5, [#allocation4]  }
 0x210   :  { %520 = dma.done.wait [#allocation4], 128  }
 0x211   :  { %521 = vsyncadd [#allocation4], 4294967168 }
 0x212   :  { %262 = vsyncpa [#allocation3], 1 }
 0x213   :  { %263 = vsyncpa [#allocation6], 1 }
 0x214   :  { %264 = vsyncpa [#allocation4], 1 }

</bundles_post_ra>
